<compile_context>
chip_gen: v7x
topology: tpu7x:2x2x1
jax: 0.10.0
libtpu: 0.0.40
codegen_flags: <defaults>
</compile_context>

<pallas_src>
from functools import partial

import jax
import jax.numpy as jnp
from jax.experimental import pallas as pl
from jax.experimental.pallas import tpu as pltpu


GROUPS = 16                       # batch elements interleaved per 128-lane row
IN_DIM, H1, H2, OUT_DIM = 8, 6, 4, 1


def _round_up(a, m):
    return (a + m - 1) // m * m


def mlp_kernel(x_ref, m1_ref, b1_ref, m2_ref, b2_ref, m3_ref, b3_ref, o_ref):
    """x_ref: (R, 128) -- 16 batch rows x 8 features interleaved per row.

    m*_ref are block-diagonal (16 copies of W.T on the diagonal), so a single
    MXU matmul applies the layer to every interleaved batch element; b*_ref
    are the matching lane-tiled f32 biases of shape (1, 16*out_dim).
    """

    def dense_sigmoid(h, m_ref, b_ref):
        z = jnp.dot(h.astype(m_ref.dtype), m_ref[...],
                    preferred_element_type=jnp.float32) + b_ref[...]
        # sigmoid(z) = 1 / (1 + exp(-z)); exp + exact reciprocal live on the
        # EUP, which has plenty of slack now that the MXU does the matmuls.
        return pl.reciprocal(1.0 + jnp.exp(-z))

    h = dense_sigmoid(x_ref[...], m1_ref, b1_ref)    # (R, 16*6)
    h = dense_sigmoid(h, m2_ref, b2_ref)             # (R, 16*4)
    h = dense_sigmoid(h, m3_ref, b3_ref)             # (R, 16*1)
    o_ref[...] = h.astype(o_ref.dtype)


def _pack_weight(w, dtype):
    # (out, in) -> (16*in, 16*out): block-diagonal with W.T on the diagonal.
    return jnp.kron(jnp.eye(GROUPS, dtype=jnp.float32),
                    w.astype(jnp.float32).T).astype(dtype)


def _pack_bias(b):
    # (out,) -> (1, 16*out) f32 (bias is added after the f32 accumulation).
    return jnp.tile(b.astype(jnp.float32), GROUPS)[None, :]


@partial(jax.jit, static_argnames=("block_rows", "compute_dtype"))
def mlp_forward(x, w1, b1, w2, b2, w3, b3, *, block_rows=2048,
                compute_dtype=jnp.float32):
    """x: (N, 8) as in the PyTorch module; returns (N, 1) float32.

    block_rows rows of the reshaped input = 16*block_rows batch elements per
    grid step (default 32768 elements ~ 1 MiB HBM/step).  v5e/v6e (128 MiB
    VMEM) can raise block_rows to ~8192; keep it <= ~3072 on v7x (64 MiB).
    """
    n = x.shape[0]
    assert x.shape[1] == IN_DIM

    # Pad N only to the next multiple of 128, then reshape (N_pad, 8) ->
    # (N_pad/16, 128): contiguous row-major, i.e. a free bitcast under jit --
    # no transpose pass and no tile-sized padding pass over x.
    n_pad = _round_up(n, 128)
    xq = x.astype(compute_dtype)
    if n_pad != n:
        xq = jnp.pad(xq, ((0, n_pad - n), (0, 0)))
    xr = xq.reshape(n_pad // GROUPS, GROUPS * IN_DIM)

    # Pack weights/biases for the interleaved layout (tiny; in a real
    # deployment these would be packed once, not per forward call).
    m1 = _pack_weight(w1, compute_dtype)     # (128, 96)
    m2 = _pack_weight(w2, compute_dtype)     # (96, 64)
    m3 = _pack_weight(w3, compute_dtype)     # (64, 16)
    b1r, b2r, b3r = _pack_bias(b1), _pack_bias(b2), _pack_bias(b3)

    r_total = n_pad // GROUPS
    if block_rows >= r_total:
        # One block would cover everything; if there is enough work, split it
        # so the "parallel" grid axis can use both TensorCores on v7x.
        r_blk = _round_up(r_total // 2, 16) if r_total >= 64 else r_total
    else:
        r_blk = _round_up(block_rows, 16)
    num_blocks = pl.cdiv(r_total, r_blk)     # ragged last block is masked

    # VMEM budget: 2x double-buffered IO blocks plus the f32 intermediates
    # Mosaic materializes -- ~24 full-width f32 row buffers (12 KiB per row).
    vmem_limit = min(96 * 1024 * 1024, 24 * 1024 * 1024 + r_blk * 12 * 1024)

    out_r = pl.pallas_call(
        mlp_kernel,
        out_shape=jax.ShapeDtypeStruct((r_total, GROUPS * OUT_DIM), jnp.float32),
        grid_spec=pltpu.PrefetchScalarGridSpec(
            num_scalar_prefetch=0,
            grid=(num_blocks,),
            in_specs=[
                pl.BlockSpec((r_blk, GROUPS * IN_DIM), lambda i: (i, 0)),  # x
                pl.BlockSpec(m1.shape, lambda i: (0, 0)),   # VMEM-resident
                pl.BlockSpec(b1r.shape, lambda i: (0, 0)),
                pl.BlockSpec(m2.shape, lambda i: (0, 0)),
                pl.BlockSpec(b2r.shape, lambda i: (0, 0)),
                pl.BlockSpec(m3.shape, lambda i: (0, 0)),
                pl.BlockSpec(b3r.shape, lambda i: (0, 0)),
            ],
            out_specs=pl.BlockSpec((r_blk, GROUPS * OUT_DIM), lambda i: (i, 0)),
        ),
        compiler_params=pltpu.CompilerParams(
            dimension_semantics=("parallel",),
            vmem_limit_bytes=int(vmem_limit),
        ),
    )(xr, m1, b1r, m2, b2r, m3, b3r)

    # (r_total, 16) row-major is exactly batch order -> slice off the padding.
    return out_r.reshape(-1)[:n].reshape(n, 1)


def init_params(key):
    # PyTorch nn.Linear default init: U(-1/sqrt(fan_in), +1/sqrt(fan_in));
    # weights (out_features, in_features), biases (out_features,).
    ks = jax.random.split(key, 6)

    def lin(kw, kb, fan_in, fan_out):
        bound = 1.0 / float(fan_in) ** 0.5
        w = jax.random.uniform(kw, (fan_out, fan_in), jnp.float32, -bound, bound)
        b = jax.random.uniform(kb, (fan_out,), jnp.float32, -bound, bound)
        return w, b

    w1, b1 = lin(ks[0], ks[1], IN_DIM, H1)
    w2, b2 = lin(ks[2], ks[3], H1, H2)
    w3, b3 = lin(ks[4], ks[5], H2, OUT_DIM)
    return w1, b1, w2, b2, w3, b3


if __name__ == "__main__":
    key = jax.random.PRNGKey(0)
    k_x, k_p = jax.random.split(key)
    params = init_params(k_p)
    w1, b1, w2, b2, w3, b3 = params

    def ref_mlp(xx):
        h = jax.nn.sigmoid(xx.astype(jnp.float32) @ w1.T + b1)
        h = jax.nn.sigmoid(h @ w2.T + b2)
        return jax.nn.sigmoid(h @ w3.T + b3)

    # Tolerances: 5e-3 covers possible reduced-precision (bf16-pass) MXU
    # lowering of the f32 matmuls; any layout/packing bug would be O(0.1-1).

    # 1) Small case matching the module spec (batch=8, in_features=8).
    x_small = jax.random.normal(k_x, (8, 8), dtype=jnp.float32)
    out_small = jax.block_until_ready(mlp_forward(x_small, *params))
    assert out_small.shape == (8, 1), out_small.shape
    assert jnp.allclose(out_small, ref_mlp(x_small), atol=5e-3), "f32 small mismatch"

    # 2) Batch exercising pad-to-128, a multi-step grid and a ragged last block.
    x_big = jax.random.normal(jax.random.PRNGKey(1), (1234, 8), dtype=jnp.float32)
    out_big = jax.block_until_ready(mlp_forward(x_big, *params))
    assert out_big.shape == (1234, 1), out_big.shape
    assert jnp.allclose(out_big, ref_mlp(x_big), atol=5e-3), "f32 big mismatch"

    # 3) bf16-input path (halves HBM traffic on v6e/v7x; f32 accumulation).
    x_bf = jax.random.normal(jax.random.PRNGKey(2), (256, 8), dtype=jnp.float32)
    out_bf = jax.block_until_ready(
        mlp_forward(x_bf, *params, compute_dtype=jnp.bfloat16))
    assert out_bf.shape == (256, 1), out_bf.shape
    assert jnp.allclose(out_bf, ref_mlp(x_bf), atol=2e-2), "bf16 mismatch"

    print("KERNEL_OK")
</pallas_src>

<mosaic_0001>
module attributes {stable_mosaic.version = 11 : i64} {
  func.func @mlp_kernel(%arg0: i32, %arg1: memref<8x128xf32, #tpu.memory_space<vmem>>, %arg2: memref<128x96xf32, #tpu.memory_space<vmem>>, %arg3: memref<1x96xf32, #tpu.memory_space<vmem>>, %arg4: memref<96x64xf32, #tpu.memory_space<vmem>>, %arg5: memref<1x64xf32, #tpu.memory_space<vmem>>, %arg6: memref<64x16xf32, #tpu.memory_space<vmem>>, %arg7: memref<1x16xf32, #tpu.memory_space<vmem>>, %arg8: memref<8x16xf32, #tpu.memory_space<vmem>>) attributes {dimension_semantics = [#tpu.dimension_semantics<parallel>], iteration_bounds = array<i64: 1>, scalar_prefetch = 0 : i64, scratch_operands = 0 : i64, tpu.core_type = #tpu.core_type<tc>, window_params = [{transform_indices = @transform_0, window_bounds = array<i64: 8, 128>}, {pipeline_mode = #tpu.pipeline_mode<synchronous>, transform_indices = @transform_1, window_bounds = array<i64: 128, 96>}, {pipeline_mode = #tpu.pipeline_mode<synchronous>, transform_indices = @transform_2, window_bounds = array<i64: 1, 96>}, {pipeline_mode = #tpu.pipeline_mode<synchronous>, transform_indices = @transform_3, window_bounds = array<i64: 96, 64>}, {pipeline_mode = #tpu.pipeline_mode<synchronous>, transform_indices = @transform_4, window_bounds = array<i64: 1, 64>}, {pipeline_mode = #tpu.pipeline_mode<synchronous>, transform_indices = @transform_5, window_bounds = array<i64: 64, 16>}, {pipeline_mode = #tpu.pipeline_mode<synchronous>, transform_indices = @transform_6, window_bounds = array<i64: 1, 16>}, {transform_indices = @transform_7, window_bounds = array<i64: 8, 16>}]} {
    %c0 = arith.constant 0 : index
    %c0_0 = arith.constant 0 : index
    %0 = vector.load %arg1[%c0, %c0_0] : memref<8x128xf32, #tpu.memory_space<vmem>>, vector<8x128xf32>
    %c0_1 = arith.constant 0 : index
    %c0_2 = arith.constant 0 : index
    %1 = vector.load %arg2[%c0_1, %c0_2] : memref<128x96xf32, #tpu.memory_space<vmem>>, vector<128x96xf32>
    %cst = arith.constant dense<0.000000e+00> : vector<8x96xf32>
    %2 = tpu.matmul %0, %1, %cst {dimension_numbers = #tpu.dot_dimension_numbers<[1], [0], [0], [1], [0, 0, 1, 1], [], []>} : vector<8x128xf32>, vector<128x96xf32>, vector<8x96xf32> -> vector<8x96xf32>
    %c0_3 = arith.constant 0 : index
    %c0_4 = arith.constant 0 : index
    %3 = vector.load %arg3[%c0_3, %c0_4] : memref<1x96xf32, #tpu.memory_space<vmem>>, vector<1x96xf32>
    %4 = vector.broadcast %3 : vector<1x96xf32> to vector<8x96xf32>
    %5 = arith.addf %2, %4 : vector<8x96xf32>
    %cst_5 = arith.constant 0.000000e+00 : f32
    %6 = vector.broadcast %cst_5 : f32 to vector<8x96xf32>
    %7 = arith.subf %6, %5 : vector<8x96xf32>
    %8 = math.exp %7 : vector<8x96xf32>
    %cst_6 = arith.constant 1.000000e+00 : f32
    %9 = vector.broadcast %cst_6 : f32 to vector<8x96xf32>
    %10 = arith.addf %9, %8 : vector<8x96xf32>
    %11 = tpu.reciprocal %10 : vector<8x96xf32> -> vector<8x96xf32>
    %c0_7 = arith.constant 0 : index
    %c0_8 = arith.constant 0 : index
    %12 = vector.load %arg4[%c0_7, %c0_8] : memref<96x64xf32, #tpu.memory_space<vmem>>, vector<96x64xf32>
    %cst_9 = arith.constant dense<0.000000e+00> : vector<8x64xf32>
    %13 = tpu.matmul %11, %12, %cst_9 {dimension_numbers = #tpu.dot_dimension_numbers<[1], [0], [0], [1], [0, 0, 1, 1], [], []>} : vector<8x96xf32>, vector<96x64xf32>, vector<8x64xf32> -> vector<8x64xf32>
    %c0_10 = arith.constant 0 : index
    %c0_11 = arith.constant 0 : index
    %14 = vector.load %arg5[%c0_10, %c0_11] : memref<1x64xf32, #tpu.memory_space<vmem>>, vector<1x64xf32>
    %15 = vector.broadcast %14 : vector<1x64xf32> to vector<8x64xf32>
    %16 = arith.addf %13, %15 : vector<8x64xf32>
    %cst_12 = arith.constant 0.000000e+00 : f32
    %17 = vector.broadcast %cst_12 : f32 to vector<8x64xf32>
    %18 = arith.subf %17, %16 : vector<8x64xf32>
    %19 = math.exp %18 : vector<8x64xf32>
    %cst_13 = arith.constant 1.000000e+00 : f32
    %20 = vector.broadcast %cst_13 : f32 to vector<8x64xf32>
    %21 = arith.addf %20, %19 : vector<8x64xf32>
    %22 = tpu.reciprocal %21 : vector<8x64xf32> -> vector<8x64xf32>
    %c0_14 = arith.constant 0 : index
    %c0_15 = arith.constant 0 : index
    %23 = vector.load %arg6[%c0_14, %c0_15] : memref<64x16xf32, #tpu.memory_space<vmem>>, vector<64x16xf32>
    %cst_16 = arith.constant dense<0.000000e+00> : vector<8x16xf32>
    %24 = tpu.matmul %22, %23, %cst_16 {dimension_numbers = #tpu.dot_dimension_numbers<[1], [0], [0], [1], [0, 0, 1, 1], [], []>} : vector<8x64xf32>, vector<64x16xf32>, vector<8x16xf32> -> vector<8x16xf32>
    %c0_17 = arith.constant 0 : index
    %c0_18 = arith.constant 0 : index
    %25 = vector.load %arg7[%c0_17, %c0_18] : memref<1x16xf32, #tpu.memory_space<vmem>>, vector<1x16xf32>
    %26 = vector.broadcast %25 : vector<1x16xf32> to vector<8x16xf32>
    %27 = arith.addf %24, %26 : vector<8x16xf32>
    %cst_19 = arith.constant 0.000000e+00 : f32
    %28 = vector.broadcast %cst_19 : f32 to vector<8x16xf32>
    %29 = arith.subf %28, %27 : vector<8x16xf32>
    %30 = math.exp %29 : vector<8x16xf32>
    %cst_20 = arith.constant 1.000000e+00 : f32
    %31 = vector.broadcast %cst_20 : f32 to vector<8x16xf32>
    %32 = arith.addf %31, %30 : vector<8x16xf32>
    %33 = tpu.reciprocal %32 : vector<8x16xf32> -> vector<8x16xf32>
    %c0_21 = arith.constant 0 : index
    %c0_22 = arith.constant 0 : index
    %34 = vector.load %arg8[%c0_21, %c0_22] : memref<8x16xf32, #tpu.memory_space<vmem>>, vector<8x16xf32>
    tpu.vector_store %arg8[%c0_21, %c0_22], %33 {strides = array<i32>} : memref<8x16xf32, #tpu.memory_space<vmem>>, vector<8x16xf32>,
    return
  }
  func.func @transform_0(%arg0: i32) -> (i32, i32) {
    %c0_i32 = arith.constant 0 : i32
    %c0_i32_0 = arith.constant 0 : i32
    return %arg0, %c0_i32 : i32, i32
  }
  func.func @transform_1(%arg0: i32) -> (i32, i32) {
    %c0_i32 = arith.constant 0 : i32
    %c0_i32_0 = arith.constant 0 : i32
    %c0_i32_1 = arith.constant 0 : i32
    return %c0_i32, %c0_i32_0 : i32, i32
  }
  func.func @transform_2(%arg0: i32) -> (i32, i32) {
    %c0_i32 = arith.constant 0 : i32
    %c0_i32_0 = arith.constant 0 : i32
    %c0_i32_1 = arith.constant 0 : i32
    return %c0_i32, %c0_i32_0 : i32, i32
  }
  func.func @transform_3(%arg0: i32) -> (i32, i32) {
    %c0_i32 = arith.constant 0 : i32
    %c0_i32_0 = arith.constant 0 : i32
    %c0_i32_1 = arith.constant 0 : i32
    return %c0_i32, %c0_i32_0 : i32, i32
  }
  func.func @transform_4(%arg0: i32) -> (i32, i32) {
    %c0_i32 = arith.constant 0 : i32
    %c0_i32_0 = arith.constant 0 : i32
    %c0_i32_1 = arith.constant 0 : i32
    return %c0_i32, %c0_i32_0 : i32, i32
  }
  func.func @transform_5(%arg0: i32) -> (i32, i32) {
    %c0_i32 = arith.constant 0 : i32
    %c0_i32_0 = arith.constant 0 : i32
    %c0_i32_1 = arith.constant 0 : i32
    return %c0_i32, %c0_i32_0 : i32, i32
  }
  func.func @transform_6(%arg0: i32) -> (i32, i32) {
    %c0_i32 = arith.constant 0 : i32
    %c0_i32_0 = arith.constant 0 : i32
    %c0_i32_1 = arith.constant 0 : i32
    return %c0_i32, %c0_i32_0 : i32, i32
  }
  func.func @transform_7(%arg0: i32) -> (i32, i32) {
    %c0_i32 = arith.constant 0 : i32
    %c0_i32_0 = arith.constant 0 : i32
    return %arg0, %c0_i32 : i32, i32
  }
}

</mosaic_0001>

<bundles_post_ra>
// kernel: tile.18
= control target key start
LH: loop header
LB: loop body
LE: loop exit
PB: predicated region body
PF: predicated region fallthrough
CT: control target
= control target key end

     0   :  { %s28_s0 = inlined_call_operand.vmem [shape: f32[6], index: 0, kind: input, shape index: {}]   ;;  %s29_s1 = inlined_call_operand.vmem [shape: f32[16,6], index: 1, kind: output, shape index: {}]  }
   0x1   :  { %v4_v0 = vld [vmem:[%s28_s0] ss:$0 sm:$0xff] }
   0x2   :  { %5 = vst [vmem:[%s29_s1] sm:$0xff] %v4_v0  ;;  %8 = vst [vmem:[%s29_s1 + $0x8] sm:$0xff] %v4_v0 }

// kernel: tile.19
= control target key start
LH: loop header
LB: loop body
LE: loop exit
PB: predicated region body
PF: predicated region fallthrough
CT: control target
= control target key end

     0   :  { %s131_s10 = smov 90   ;;  %s132_s11 = smov 78   ;;  %vm3_vm0 = vcmask 48128   ;;  %vm9_vm1 = vcmask 786128   ;;  %vm15_vm2 = vcmask 736928   ;;  %vm21_vm3 = vcmask 687728   ;;  %s207_s0 = inlined_call_operand.vmem [shape: f32[16,6], index: 0, kind: input, shape index: {}]   ;;  %s208_s1 = inlined_call_operand.vmem [shape: f32[1,96], index: 1, kind: output, shape index: {}]  }
   0x1   :  { %v101_v0 = vld [vmem:[%s207_s0 + $0xf] sm:$0x1]   ;;  %v103_v1 = vld [vmem:[%s207_s0 + $0xd] sm:$0x1]   ;;  %v102_v2 = vld [vmem:[%s207_s0 + $0xe] sm:$0x1]  }
   0x2   :  { %7 = vrot.lane.b32.xlu0 %v101_v0, %s131_s10  ;;  %19 = vrot.lane.b32.xlu1 %v103_v1, %s132_s11  ;;  %v104_v3 = vld [vmem:[%s207_s0 + $0xc] sm:$0x1]   ;;  %s133_s16 = smov 84   ;;  %s134_s17 = smov 72   ;;  %v105_v4 = vld [vmem:[%s207_s0 + $0xb] sm:$0x1]  }
   0x3   :  { %v106_v5 = vld [vmem:[%s207_s0 + $0xa] sm:$0x1]   ;;  %v2_v6 = vld [vmem:[%s207_s0] sm:$0x1]   ;;  %s135_s24 = smov 66   ;;  %s136_s25 = smov 60  }
   0x4   :  { %4 = vst.msk [vmem:[#allocation0] sm:$0x1] %vm3_vm0, %v2_v6   ;;  %v107_v7 = vld [vmem:[%s207_s0 + $0x9] sm:$0x1]   ;;  %v108_v8 = vld [vmem:[%s207_s0 + $0x8] sm:$0x1]  }
   0x5   :  { %s137_s30 = smov 54   ;;  %s138_s2 = smov 48   ;;  %v109_v9 = vld [vmem:[%s207_s0 + $0x7] sm:$0x1]   ;;  %v110_v10 = vld [vmem:[%s207_s0 + $0x6] sm:$0x1]  }
   0x6   :  { %13 = vrot.lane.b32.xlu0 %v102_v2, %s133_s16  ;;  %25 = vrot.lane.b32.xlu1 %v104_v3, %s134_s17  ;;  %s139_s7 = smov 42   ;;  %s140_s8 = smov 36   ;;  %v111_v11 = vld [vmem:[%s207_s0 + $0x5] sm:$0x1]   ;;  %v112_v12 = vld [vmem:[%s207_s0 + $0x4] sm:$0x1]  }
   0x7   :  { %s141_s13 = smov 30   ;;  %s142_s14 = smov 24   ;;  %v113_v13 = vld [vmem:[%s207_s0 + $0x3] sm:$0x1]   ;;  %v114_v14 = vld [vmem:[%s207_s0 + $0x2] sm:$0x1]  }
   0x8   :  { %s143_s19 = smov 18   ;;  %s144_s20 = smov 12   ;;  %v115_v15 = vld [vmem:[%s207_s0 + $0x1] sm:$0x1]   ;;  %vm27_vm4 = vcmask 638528   ;;  %vm33_vm5 = vcmask 589328  }
   0x9   :  { %s145_s0 = smov 6   ;;  %vm39_vm6 = vcmask 540128   ;;  %vm45_vm7 = vcmask 490928   ;;  %vm51_vm8 = vcmask 441728   ;;  %vm57_vm9 = vcmask 392528  }
   0xa   :  { %31 = vrot.lane.b32.xlu0 %v105_v4, %s135_s24  ;;  %37 = vrot.lane.b32.xlu1 %v106_v5, %s136_s25  ;;  %vm63_vm10 = vcmask 343328   ;;  %vm69_vm11 = vcmask 294128   ;;  %vm75_vm12 = vcmask 244928   ;;  %vm81_vm13 = vcmask 195728  }
   0xb   :  { %vm87_vm14 = vcmask 146528   ;;  %vm93_vm15 = vcmask 97328  }
   0xe   :  { %43 = vrot.lane.b32.xlu0 %v107_v7, %s137_s30  ;;  %49 = vrot.lane.b32.xlu1 %v108_v8, %s138_s2 }
  0x12   :  { %55 = vrot.lane.b32.xlu0 %v109_v9, %s139_s7  ;;  %61 = vrot.lane.b32.xlu1 %v110_v10, %s140_s8 }
  0x16   :  { %67 = vrot.lane.b32.xlu0 %v111_v11, %s141_s13  ;;  %73 = vrot.lane.b32.xlu1 %v112_v12, %s142_s14 }
  0x1a   :  { %79 = vrot.lane.b32.xlu0 %v113_v13, %s143_s19  ;;  %85 = vrot.lane.b32.xlu1 %v114_v14, %s144_s20 }
  0x1e   :  { %91 = vrot.lane.b32.xlu0 %v115_v15, %s145_s0 }
  0x74   :  { %v8_v16 = vpop.permute.xlu0 %7   ;;  %v20_v17 = vpop.permute.xlu1 %19  }
  0x75   :  { %10 = vst.msk [vmem:[#allocation0] sm:$0x1] %vm9_vm1, %v8_v16  }
  0x78   :  { %v14_v18 = vpop.permute.xlu0 %13   ;;  %v26_v19 = vpop.permute.xlu1 %25  }
  0x79   :  { %16 = vst.msk [vmem:[#allocation0] sm:$0x1] %vm15_vm2, %v14_v18  }
  0x7a   :  { %22 = vst.msk [vmem:[#allocation0] sm:$0x1] %vm21_vm3, %v20_v17  }
  0x7b   :  { %28 = vst.msk [vmem:[#allocation0] sm:$0x1] %vm27_vm4, %v26_v19  }
  0x7c   :  { %v32_v20 = vpop.permute.xlu0 %31   ;;  %v38_v21 = vpop.permute.xlu1 %37  }
  0x7d   :  { %34 = vst.msk [vmem:[#allocation0] sm:$0x1] %vm33_vm5, %v32_v20  }
  0x7e   :  { %40 = vst.msk [vmem:[#allocation0] sm:$0x1] %vm39_vm6, %v38_v21  }
  0x80   :  { %v44_v22 = vpop.permute.xlu0 %43   ;;  %v50_v23 = vpop.permute.xlu1 %49  }
  0x81   :  { %46 = vst.msk [vmem:[#allocation0] sm:$0x1] %vm45_vm7, %v44_v22  }
  0x82   :  { %52 = vst.msk [vmem:[#allocation0] sm:$0x1] %vm51_vm8, %v50_v23  }
  0x84   :  { %v56_v24 = vpop.permute.xlu0 %55   ;;  %v62_v25 = vpop.permute.xlu1 %61  }
  0x85   :  { %58 = vst.msk [vmem:[#allocation0] sm:$0x1] %vm57_vm9, %v56_v24  }
  0x86   :  { %64 = vst.msk [vmem:[#allocation0] sm:$0x1] %vm63_vm10, %v62_v25  }
  0x88   :  { %v68_v26 = vpop.permute.xlu0 %67   ;;  %v74_v27 = vpop.permute.xlu1 %73  }
  0x89   :  { %70 = vst.msk [vmem:[#allocation0] sm:$0x1] %vm69_vm11, %v68_v26  }
  0x8a   :  { %76 = vst.msk [vmem:[#allocation0] sm:$0x1] %vm75_vm12, %v74_v27  }
  0x8c   :  { %v80_v28 = vpop.permute.xlu0 %79   ;;  %v86_v29 = vpop.permute.xlu1 %85  }
  0x8d   :  { %82 = vst.msk [vmem:[#allocation0] sm:$0x1] %vm81_vm13, %v80_v28  }
  0x8e   :  { %88 = vst.msk [vmem:[#allocation0] sm:$0x1] %vm87_vm14, %v86_v29  }
  0x90   :  { %v92_v30 = vpop.permute.xlu0 %91  }
  0x91   :  { %94 = vst.msk [vmem:[#allocation0] sm:$0x1] %vm93_vm15, %v92_v30  }
  0x98   :  { %v98_v31 = vld [vmem:[#allocation0] sm:$0x1] }
  0x99   :  { %100 = vst [vmem:[%s208_s1] sm:$0x1] %v98_v31 }

// kernel: tile.24
= control target key start
LH: loop header
LB: loop body
LE: loop exit
PB: predicated region body
PF: predicated region fallthrough
CT: control target
= control target key end

     0   :  { %s131_s10 = smov 60   ;;  %s132_s11 = smov 52   ;;  %vm3_vm0 = vcmask 31744   ;;  %vm9_vm1 = vcmask 523744   ;;  %vm15_vm2 = vcmask 490944   ;;  %vm21_vm3 = vcmask 458144   ;;  %s207_s0 = inlined_call_operand.vmem [shape: f32[16,4], index: 0, kind: input, shape index: {}]   ;;  %s208_s1 = inlined_call_operand.vmem [shape: f32[1,64], index: 1, kind: output, shape index: {}]  }
   0x1   :  { %v101_v0 = vld [vmem:[%s207_s0 + $0xf] sm:$0x1]   ;;  %v103_v1 = vld [vmem:[%s207_s0 + $0xd] sm:$0x1]   ;;  %v102_v2 = vld [vmem:[%s207_s0 + $0xe] sm:$0x1]  }
   0x2   :  { %7 = vrot.lane.b32.xlu0 %v101_v0, %s131_s10  ;;  %19 = vrot.lane.b32.xlu1 %v103_v1, %s132_s11  ;;  %v104_v3 = vld [vmem:[%s207_s0 + $0xc] sm:$0x1]   ;;  %s133_s16 = smov 56   ;;  %s134_s17 = smov 48   ;;  %v105_v4 = vld [vmem:[%s207_s0 + $0xb] sm:$0x1]  }
   0x3   :  { %v106_v5 = vld [vmem:[%s207_s0 + $0xa] sm:$0x1]   ;;  %v2_v6 = vld [vmem:[%s207_s0] sm:$0x1]   ;;  %s135_s24 = smov 44   ;;  %s136_s25 = smov 40  }
   0x4   :  { %4 = vst.msk [vmem:[#allocation0] sm:$0x1] %vm3_vm0, %v2_v6   ;;  %v107_v7 = vld [vmem:[%s207_s0 + $0x9] sm:$0x1]   ;;  %v108_v8 = vld [vmem:[%s207_s0 + $0x8] sm:$0x1]  }
   0x5   :  { %s137_s30 = smov 36   ;;  %s138_s2 = smov 32   ;;  %v109_v9 = vld [vmem:[%s207_s0 + $0x7] sm:$0x1]   ;;  %v110_v10 = vld [vmem:[%s207_s0 + $0x6] sm:$0x1]  }
   0x6   :  { %13 = vrot.lane.b32.xlu0 %v102_v2, %s133_s16  ;;  %25 = vrot.lane.b32.xlu1 %v104_v3, %s134_s17  ;;  %s139_s7 = smov 28   ;;  %s140_s8 = smov 24   ;;  %v111_v11 = vld [vmem:[%s207_s0 + $0x5] sm:$0x1]   ;;  %v112_v12 = vld [vmem:[%s207_s0 + $0x4] sm:$0x1]  }
   0x7   :  { %s141_s13 = smov 20   ;;  %s142_s14 = smov 16   ;;  %v113_v13 = vld [vmem:[%s207_s0 + $0x3] sm:$0x1]   ;;  %v114_v14 = vld [vmem:[%s207_s0 + $0x2] sm:$0x1]  }
   0x8   :  { %s143_s19 = smov 12   ;;  %s144_s20 = smov 8   ;;  %v115_v15 = vld [vmem:[%s207_s0 + $0x1] sm:$0x1]   ;;  %vm27_vm4 = vcmask 425344   ;;  %vm33_vm5 = vcmask 392544  }
   0x9   :  { %s145_s0 = smov 4   ;;  %vm39_vm6 = vcmask 359744   ;;  %vm45_vm7 = vcmask 326944   ;;  %vm51_vm8 = vcmask 294144   ;;  %vm57_vm9 = vcmask 261344  }
   0xa   :  { %31 = vrot.lane.b32.xlu0 %v105_v4, %s135_s24  ;;  %37 = vrot.lane.b32.xlu1 %v106_v5, %s136_s25  ;;  %vm63_vm10 = vcmask 228544   ;;  %vm69_vm11 = vcmask 195744   ;;  %vm75_vm12 = vcmask 162944   ;;  %vm81_vm13 = vcmask 130144  }
   0xb   :  { %vm87_vm14 = vcmask 97344   ;;  %vm93_vm15 = vcmask 64544  }
   0xe   :  { %43 = vrot.lane.b32.xlu0 %v107_v7, %s137_s30  ;;  %49 = vrot.lane.b32.xlu1 %v108_v8, %s138_s2 }
  0x12   :  { %55 = vrot.lane.b32.xlu0 %v109_v9, %s139_s7  ;;  %61 = vrot.lane.b32.xlu1 %v110_v10, %s140_s8 }
  0x16   :  { %67 = vrot.lane.b32.xlu0 %v111_v11, %s141_s13  ;;  %73 = vrot.lane.b32.xlu1 %v112_v12, %s142_s14 }
  0x1a   :  { %79 = vrot.lane.b32.xlu0 %v113_v13, %s143_s19  ;;  %85 = vrot.lane.b32.xlu1 %v114_v14, %s144_s20 }
  0x1e   :  { %91 = vrot.lane.b32.xlu0 %v115_v15, %s145_s0 }
  0x74   :  { %v8_v16 = vpop.permute.xlu0 %7   ;;  %v20_v17 = vpop.permute.xlu1 %19  }
  0x75   :  { %10 = vst.msk [vmem:[#allocation0] sm:$0x1] %vm9_vm1, %v8_v16  }
  0x78   :  { %v14_v18 = vpop.permute.xlu0 %13   ;;  %v26_v19 = vpop.permute.xlu1 %25  }
  0x79   :  { %16 = vst.msk [vmem:[#allocation0] sm:$0x1] %vm15_vm2, %v14_v18  }
  0x7a   :  { %22 = vst.msk [vmem:[#allocation0] sm:$0x1] %vm21_vm3, %v20_v17  }
  0x7b   :  { %28 = vst.msk [vmem:[#allocation0] sm:$0x1] %vm27_vm4, %v26_v19  }
  0x7c   :  { %v32_v20 = vpop.permute.xlu0 %31   ;;  %v38_v21 = vpop.permute.xlu1 %37  }
  0x7d   :  { %34 = vst.msk [vmem:[#allocation0] sm:$0x1] %vm33_vm5, %v32_v20  }
  0x7e   :  { %40 = vst.msk [vmem:[#allocation0] sm:$0x1] %vm39_vm6, %v38_v21  }
  0x80   :  { %v44_v22 = vpop.permute.xlu0 %43   ;;  %v50_v23 = vpop.permute.xlu1 %49  }
  0x81   :  { %46 = vst.msk [vmem:[#allocation0] sm:$0x1] %vm45_vm7, %v44_v22  }
  0x82   :  { %52 = vst.msk [vmem:[#allocation0] sm:$0x1] %vm51_vm8, %v50_v23  }
  0x84   :  { %v56_v24 = vpop.permute.xlu0 %55   ;;  %v62_v25 = vpop.permute.xlu1 %61  }
  0x85   :  { %58 = vst.msk [vmem:[#allocation0] sm:$0x1] %vm57_vm9, %v56_v24  }
  0x86   :  { %64 = vst.msk [vmem:[#allocation0] sm:$0x1] %vm63_vm10, %v62_v25  }
  0x88   :  { %v68_v26 = vpop.permute.xlu0 %67   ;;  %v74_v27 = vpop.permute.xlu1 %73  }
  0x89   :  { %70 = vst.msk [vmem:[#allocation0] sm:$0x1] %vm69_vm11, %v68_v26  }
  0x8a   :  { %76 = vst.msk [vmem:[#allocation0] sm:$0x1] %vm75_vm12, %v74_v27  }
  0x8c   :  { %v80_v28 = vpop.permute.xlu0 %79   ;;  %v86_v29 = vpop.permute.xlu1 %85  }
  0x8d   :  { %82 = vst.msk [vmem:[#allocation0] sm:$0x1] %vm81_vm13, %v80_v28  }
  0x8e   :  { %88 = vst.msk [vmem:[#allocation0] sm:$0x1] %vm87_vm14, %v86_v29  }
  0x90   :  { %v92_v30 = vpop.permute.xlu0 %91  }
  0x91   :  { %94 = vst.msk [vmem:[#allocation0] sm:$0x1] %vm93_vm15, %v92_v30  }
  0x98   :  { %v98_v31 = vld [vmem:[#allocation0] sm:$0x1] }
  0x99   :  { %100 = vst [vmem:[%s208_s1] sm:$0x1] %v98_v31 }

// kernel: mlp_forward.1
= control target key start
LH: loop header
LB: loop body
LE: loop exit
PB: predicated region body
PF: predicated region fallthrough
CT: control target
= control target key end

     0   :  { %v517_v0 = vmov 0.0|0.0   ;;  %vm518_vm0 = vmmov 0   ;;  %v519_v4 = vmov 0.0   ;;  %vm144_vm1 = vcmask 785408   ;;  %s707_s1 = inlined_call_operand.vmem [shape: f32[128,96], index: 1, kind: input, shape index: {}]   ;;  %s708_s0 = inlined_call_operand.vmem [shape: f32[8,128], index: 0, kind: input, shape index: {}]   ;;  %s709_s3 = inlined_call_operand.vmem [shape: f32[96,64], index: 3, kind: input, shape index: {}]   ;;  %s710_s2 = inlined_call_operand.vmem [shape: f32[1,96], index: 2, kind: input, shape index: {}]   ;;  %s711_s5 = inlined_call_operand.vmem [shape: f32[64,16], index: 5, kind: input, shape index: {}]   ;;  %s712_s4 = inlined_call_operand.vmem [shape: f32[1,64], index: 4, kind: input, shape index: {}]   ;;  %s713_s6 = inlined_call_operand.vmem [shape: f32[1,16], index: 6, kind: input, shape index: {}]   ;;  %s714_s7 = inlined_call_operand.vmem [shape: f32[8,16], index: 7, kind: output, shape index: {}]  }
   0x1   :  { %448 = vmatprep.subr.bf16.mxu0 %v517_v0  ;;  %v27_v1 = vld [vmem:[%s707_s1] sm:$0xff]  ;;  %v28_v2 = vld [vmem:[%s707_s1 + $0x8] sm:$0xff]  ;;  %v29_v3 = vld [vmem:[%s707_s1 + $0x10] sm:$0xff]  ;;  %399 = vmatprep.mubr.msk.f32.mxu0 %vm518_vm0, %v519_v4  ;;  %vm238_vm2 = vcmask 523264   ;;  %vm317_vm3 = vcmask 130048  }
   0x2   :  { %v449_v5 = vpack.c.bf16 %v28_v2, %v27_v1  ;;  %v30_v6 = vld [vmem:[%s707_s1 + $0x18] sm:$0xff]  ;;  %472 = vmatprep.subr.bf16.mxu1 %v517_v0  ;;  %426 = vmatprep.mubr.msk.f32.mxu1 %vm518_vm0, %v519_v4  ;;  %v31_v8 = vld [vmem:[%s707_s1 + $0x20] sm:$0xff]  ;;  %v32_v9 = vld [vmem:[%s707_s1 + $0x28] sm:$0xff] }
   0x3   :  { %v452_v7 = vpack.c.bf16 %v30_v6, %v29_v3  ;;  %v455_v10 = vpack.c.bf16 %v32_v9, %v31_v8  ;;  %v33_v11 = vld [vmem:[%s707_s1 + $0x30] sm:$0xff]  ;;  %v34_v12 = vld [vmem:[%s707_s1 + $0x38] sm:$0xff]  ;;  %v35_v14 = vld [vmem:[%s707_s1 + $0x40] sm:$0xff] }
   0x4   :  { %450 = vmatpush3.bf16.msra.mxu0 %v449_v5  ;;  %v458_v13 = vpack.c.bf16 %v34_v12, %v33_v11  ;;  %v36_v15 = vld [vmem:[%s707_s1 + $0x48] sm:$0xff]  ;;  %v37_v17 = vld [vmem:[%s707_s1 + $0x50] sm:$0xff]  ;;  %v38_v18 = vld [vmem:[%s707_s1 + $0x58] sm:$0xff] }
   0x5   :  { %451 = vmatprep.subr.bf16.mxu0 %v517_v0  ;;  %v461_v16 = vpack.c.bf16 %v36_v15, %v35_v14  ;;  %v464_v19 = vpack.c.bf16 %v38_v18, %v37_v17  ;;  %v39_v20 = vld [vmem:[%s707_s1 + $0x60] sm:$0xff]  ;;  %v40_v21 = vld [vmem:[%s707_s1 + $0x68] sm:$0xff]  ;;  %v41_v23 = vld [vmem:[%s707_s1 + $0x70] sm:$0xff] }
   0x6   :  { %v467_v22 = vpack.c.bf16 %v40_v21, %v39_v20  ;;  %v42_v24 = vld [vmem:[%s707_s1 + $0x78] sm:$0xff]  ;;  %v26_v26 = vld [vmem:[%s708_s0] sm:$0xff]  ;;  %v126_v28 = vld [vmem:[%s709_s3 + $0x8] sm:$0xff] }
   0x7   :  { %v470_v25 = vpack.c.bf16 %v42_v24, %v41_v23  ;;  %v125_v27 = vld [vmem:[%s709_s3] sm:$0xff]  ;;  %v127_v30 = vld [vmem:[%s709_s3 + $0x10] sm:$0xff]  ;;  %v128_v31 = vld [vmem:[%s709_s3 + $0x18] sm:$0xff] }
   0x8   :  { %453 = vmatpush3.bf16.msra.mxu0 %v452_v7  ;;  %v473_v29 = vpack.c.bf16 %v126_v28, %v125_v27  ;;  %v476_v32 = vpack.c.bf16 %v128_v31, %v127_v30  ;;  %v129_v33 = vld [vmem:[%s709_s3 + $0x20] sm:$0xff]  ;;  %v130_v34 = vld [vmem:[%s709_s3 + $0x28] sm:$0xff]  ;;  %v131_v36 = vld [vmem:[%s709_s3 + $0x30] sm:$0xff] }
   0x9   :  { %454 = vmatprep.subr.bf16.mxu0 %v517_v0  ;;  %v479_v35 = vpack.c.bf16 %v130_v34, %v129_v33  ;;  %v132_v37 = vld [vmem:[%s709_s3 + $0x38] sm:$0xff]  ;;  %v133_v39 = vld [vmem:[%s709_s3 + $0x40] sm:$0xff]  ;;  %v134_v40 = vld [vmem:[%s709_s3 + $0x48] sm:$0xff] }
   0xa   :  { %474 = vmatpush3.bf16.msra.mxu1 %v473_v29  ;;  %v482_v38 = vpack.c.bf16 %v132_v37, %v131_v36  ;;  %v485_v41 = vpack.c.bf16 %v134_v40, %v133_v39  ;;  %v135_v42 = vld [vmem:[%s709_s3 + $0x50] sm:$0xff]  ;;  %v136_v43 = vld [vmem:[%s709_s3 + $0x58] sm:$0xff]  ;;  %v323_v45 = vld [vmem:[%s710_s2] ss:$0 sm:$0xff] }
   0xb   :  { %475 = vmatprep.subr.bf16.mxu1 %v517_v0  ;;  %v488_v44 = vpack.c.bf16 %v136_v43, %v135_v42  ;;  %v223_v54 = vld [vmem:[%s711_s5] sm:$0xff]  ;;  %v224_v55 = vld [vmem:[%s711_s5 + $0x8] sm:$0xff]  ;;  %v225_v57 = vld [vmem:[%s711_s5 + $0x10] sm:$0xff] }
   0xc   :  { %456 = vmatpush3.bf16.msra.mxu0 %v455_v10  ;;  %v491_v56 = vpack.c.bf16 %v224_v55, %v223_v54  ;;  %v226_v58 = vld [vmem:[%s711_s5 + $0x18] sm:$0xff]  ;;  %v227_v60 = vld [vmem:[%s711_s5 + $0x20] sm:$0xff]  ;;  %v228_v61 = vld [vmem:[%s711_s5 + $0x28] sm:$0xff] }
   0xd   :  { %457 = vmatprep.subr.bf16.mxu0 %v517_v0  ;;  %v494_v59 = vpack.c.bf16 %v226_v58, %v225_v57  ;;  %v497_v62 = vpack.c.bf16 %v228_v61, %v227_v60  ;;  %v229_v63 = vld [vmem:[%s711_s5 + $0x30] sm:$0xff]  ;;  %v230_v1 = vld [vmem:[%s711_s5 + $0x38] sm:$0xff]  ;;  %v324_v3 = vld [vmem:[%s712_s4] ss:$0 sm:$0xff] }
   0xe   :  { %477 = vmatpush3.bf16.msra.mxu1 %v476_v32  ;;  %v500_v2 = vpack.c.bf16 %v230_v1, %v229_v63 }
   0xf   :  { %478 = vmatprep.subr.bf16.mxu1 %v517_v0 }
  0x10   :  { %459 = vmatpush3.bf16.msra.mxu0 %v458_v13 }
  0x11   :  { %460 = vmatprep.subr.bf16.mxu0 %v517_v0 }
  0x12   :  { %480 = vmatpush3.bf16.msra.mxu1 %v479_v35 }
  0x13   :  { %481 = vmatprep.subr.bf16.mxu1 %v517_v0 }
  0x14   :  { %462 = vmatpush3.bf16.msra.mxu0 %v461_v16 }
  0x15   :  { %463 = vmatprep.subr.bf16.mxu0 %v517_v0 }
  0x16   :  { %483 = vmatpush3.bf16.msra.mxu1 %v482_v38 }
  0x17   :  { %484 = vmatprep.subr.bf16.mxu1 %v517_v0 }
  0x18   :  { %465 = vmatpush3.bf16.msra.mxu0 %v464_v19 }
  0x19   :  { %466 = vmatprep.subr.bf16.mxu0 %v517_v0 }
  0x1a   :  { %486 = vmatpush3.bf16.msra.mxu1 %v485_v41 }
  0x1b   :  { %487 = vmatprep.subr.bf16.mxu1 %v517_v0 }
  0x1c   :  { %468 = vmatpush3.bf16.msra.mxu0 %v467_v22 }
  0x1d   :  { %469 = vmatprep.subr.bf16.mxu0 %v517_v0 }
  0x1e   :  { %489 = vmatpush3.bf16.msra.mxu1 %v488_v44 }
  0x1f   :  { %490 = vmatprep.subr.bf16.mxu1 %v517_v0 }
  0x20   :  { %471 = vmatpush3.bf16.msra.mxu0 %v470_v25 }
  0x23   :  { %400 = vmatmul.mubr.f32.vlgmr.msra.gmra.mrb[0].mxu0 %v26_v26 }
  0xf6   :  { %v116_v46 = vpop.f32.mrb[0].mxu0 }
  0xf7   :  { %v117_v47 = vadd.f32 %v323_v45, %v116_v46  ;;  %v401_v48 = vpop.f32.mrb[1].mxu0 }
  0xf9   :  { %v120_v49 = vsub.f32 0.0, %v117_v47 }
  0xfb   :  { %v121_v50 = vmul.f32 1.442695, %v120_v49 }
  0xfd   :  { %505 = vpow2.f32 %v121_v50 }
 0x107   :  { %v506_v51 = vpop.eup %505 }
 0x108   :  { %v123_v52 = vadd.f32 1.0, %v506_v51 }
 0x10a   :  { %507 = vrcp.f32 %v123_v52 }
 0x114   :  { %v508_v53 = vpop.eup %507 }
 0x115   :  { %427 = vmatmul.mubr.msk.f32.vlgmr.msra.gmra.mrb[0].mxu1 %vm144_vm1, %v508_v53 }
 0x116   :  { %445 = vmatprep.mubr.msk.f32.mxu1 %vm518_vm0, %v519_v4  ;;  %492 = vmatpush3.bf16.msra.mxu1 %v491_v56 }
 0x117   :  { %493 = vmatprep.subr.bf16.mxu1 %v517_v0 }
 0x11a   :  { %495 = vmatpush3.bf16.msra.mxu1 %v494_v59 }
 0x11b   :  { %496 = vmatprep.subr.bf16.mxu1 %v517_v0 }
 0x11e   :  { %498 = vmatpush3.bf16.msra.mxu1 %v497_v62 }
 0x11f   :  { %499 = vmatprep.subr.bf16.mxu1 %v517_v0  ;;  %v326_v0 = vld [vmem:[%s713_s6] ss:$0 sm:$0xff] }
 0x122   :  { %501 = vmatpush3.bf16.msra.mxu1 %v500_v2 }
 0x1e8   :  { %v214_v4 = vpop.f32.mrb[0].mxu1 }
 0x1e9   :  { %v215_v5 = vadd.f32 %v324_v3, %v214_v4  ;;  %v428_v6 = vpop.f32.mrb[1].mxu1 }
 0x1eb   :  { %v218_v7 = vsub.f32 0.0, %v215_v5 }
 0x1ed   :  { %v219_v8 = vmul.f32 1.442695, %v218_v7 }
 0x1ef   :  { %509 = vpow2.f32 %v219_v8 }
 0x1f9   :  { %v510_v9 = vpop.eup %509 }
 0x1fa   :  { %v221_v10 = vadd.f32 1.0, %v510_v9 }
 0x1fc   :  { %511 = vrcp.f32 %v221_v10 }
 0x206   :  { %v512_v11 = vpop.eup %511 }
 0x207   :  { %446 = vmatmul.mubr.msk.f32.vlgmr.msra.gmra.mrb[2].mxu1 %vm238_vm2, %v512_v11 }
 0x2da   :  { %v308_v12 = vpop.f32.mrb[2].mxu1 }
 0x2db   :  { %v309_v13 = vadd.f32 %v326_v0, %v308_v12  ;;  %v447_v14 = vpop.f32.mrb[3].mxu1 }
 0x2dd   :  { %v312_v15 = vsub.f32 0.0, %v309_v13 }
 0x2df   :  { %v313_v16 = vmul.f32 1.442695, %v312_v15 }
 0x2e1   :  { %513 = vpow2.f32 %v313_v16 }
 0x2eb   :  { %v514_v17 = vpop.eup %513 }
 0x2ec   :  { %v315_v18 = vadd.f32 1.0, %v514_v17 }
 0x2ee   :  { %515 = vrcp.f32 %v315_v18 }
 0x2f8   :  { %v516_v19 = vpop.eup %515 }
 0x2f9   :  { %318 = vst.msk [vmem:[%s714_s7] sm:$0xff] %vm317_vm3, %v516_v19 }

</bundles_post_ra>
